<compile_context>
chip_gen: v7x
topology: tpu7x:2x2x1
jax: 0.10.0
libtpu: 0.0.40
codegen_flags: <defaults>
</compile_context>

<pallas_src>
import functools

import jax
import jax.numpy as jnp
from jax.experimental import pallas as pl
from jax.experimental.pallas import tpu as pltpu


def _convblock_kernel(x_ref, w1_ref, b1_ref, w2_ref, b2_ref, out_ref, *, H, W):
    # x_ref  : (1, C1, H*W)   one image; channels on sublanes, pixels on lanes
    # w1_ref : (C2, 9*C1)     conv1 weights (bf16), tap-major then in-channel
    # b1_ref : (C2, 1)        conv1 bias (fp32)
    # w2_ref : (C1, 9*C2)     conv2 weights (bf16)
    # b2_ref : (C1, 1)        conv2 bias (fp32)
    # out_ref: (1, C1, H*W)   lane-dense output block
    HW = H * W
    x = x_ref[0]  # (C1, HW) fp32

    # Boundary masks, computed once and reused by both convs.  Flat pixel
    # index p = i*W + j: row bounds reduce to comparisons on p, column bounds
    # need j = p mod W (bitwise AND when W is a power of two).
    p = jax.lax.broadcasted_iota(jnp.int32, (1, HW), 1)
    if (W & (W - 1)) == 0:
        col = p & (W - 1)
    else:
        col = jax.lax.rem(p, W)
    row_ge_1 = p >= W                 # input row i-1 exists
    row_le_hm2 = p < (H - 1) * W      # input row i+1 exists
    col_ge_1 = col >= 1               # input col j-1 exists
    col_le_wm2 = col <= W - 2         # input col j+1 exists

    def im2col(a):
        """(C, HW) -> (9*C, HW): the 9 shifted & edge-masked taps, kh-major."""
        taps = []
        for dh in (-1, 0, 1):
            for dw in (-1, 0, 1):
                shift = dh * W + dw
                t = a if shift == 0 else pltpu.roll(a, (-shift) % HW, axis=1)
                mask = None
                if dh == -1:
                    mask = row_ge_1
                elif dh == 1:
                    mask = row_le_hm2
                if dw == -1:
                    mask = col_ge_1 if mask is None else mask & col_ge_1
                elif dw == 1:
                    mask = col_le_wm2 if mask is None else mask & col_le_wm2
                if mask is not None:
                    t = jnp.where(mask, t, 0.0)
                taps.append(t)
        return jnp.concatenate(taps, axis=0)

    # conv1 (3x3, stride 1, pad 1) + ReLU: one (C2, 9*C1) @ (9*C1, HW) matmul.
    slab1 = im2col(x).astype(jnp.bfloat16)
    y1 = jnp.dot(w1_ref[...], slab1, preferred_element_type=jnp.float32)
    y1 = jnp.maximum(y1 + b1_ref[...], 0.0)            # (C2, HW) fp32

    # conv2 (3x3, stride 1, pad 1) + ReLU -- same scheme, no padded scratch.
    slab2 = im2col(y1).astype(jnp.bfloat16)
    y2 = jnp.dot(w2_ref[...], slab2, preferred_element_type=jnp.float32)
    y2 = jnp.maximum(y2 + b2_ref[...], 0.0)            # (C1, HW) fp32

    out_ref[0] = y2.astype(out_ref.dtype)


def conv_block(x_nchw, w1, b1, w2, b2):
    """x: (N, C1, H, W); w1: (C2, C1, 3, 3); w2: (C1, C2, 3, 3) (PyTorch OIHW)."""
    N, C1, H, W = x_nchw.shape
    C2 = w1.shape[0]
    HW = H * W

    # Keep NCHW; only flatten H,W (free, contiguous reshape) so the pixel axis
    # sits on the lane axis inside the kernel.
    x_flat = x_nchw.reshape(N, C1, HW)

    # OIHW -> (Cout, 9*Cin), tap-major (kh, kw) then input channel, matching
    # the kernel's im2col ordering.  bf16 operands, fp32 accumulation.
    w1_k = jnp.transpose(w1, (0, 2, 3, 1)).reshape(C2, 9 * C1).astype(jnp.bfloat16)
    w2_k = jnp.transpose(w2, (0, 2, 3, 1)).reshape(C1, 9 * C2).astype(jnp.bfloat16)
    b1_k = b1.reshape(C2, 1).astype(jnp.float32)
    b2_k = b2.reshape(C1, 1).astype(jnp.float32)

    kernel = functools.partial(_convblock_kernel, H=H, W=W)

    out_flat = pl.pallas_call(
        kernel,
        out_shape=jax.ShapeDtypeStruct((N, C1, HW), x_nchw.dtype),
        grid_spec=pltpu.PrefetchScalarGridSpec(
            num_scalar_prefetch=0,
            grid=(N,),   # one image per step; N>=2 keeps both v7x TCs busy
            in_specs=[
                pl.BlockSpec((1, C1, HW), lambda n: (n, 0, 0)),
                pl.BlockSpec((C2, 9 * C1), lambda n: (0, 0)),
                pl.BlockSpec((C2, 1), lambda n: (0, 0)),
                pl.BlockSpec((C1, 9 * C2), lambda n: (0, 0)),
                pl.BlockSpec((C1, 1), lambda n: (0, 0)),
            ],
            out_specs=pl.BlockSpec((1, C1, HW), lambda n: (n, 0, 0)),
        ),
        compiler_params=pltpu.CompilerParams(
            dimension_semantics=("parallel",)),
    )(x_flat, w1_k, b1_k, w2_k, b2_k)

    return out_flat.reshape(N, C1, H, W)


def _reference(x_nchw, w1, b1, w2, b2):
    """Pure-JAX fp32 reference using lax.conv (NCHW / OIHW), for verification."""
    dn = jax.lax.conv_dimension_numbers(x_nchw.shape, w1.shape,
                                        ("NCHW", "OIHW", "NCHW"))
    y = jax.lax.conv_general_dilated(x_nchw, w1, (1, 1), ((1, 1), (1, 1)),
                                     dimension_numbers=dn)
    y = jnp.maximum(y + b1[None, :, None, None], 0.0)
    dn2 = jax.lax.conv_dimension_numbers(y.shape, w2.shape,
                                         ("NCHW", "OIHW", "NCHW"))
    z = jax.lax.conv_general_dilated(y, w2, (1, 1), ((1, 1), (1, 1)),
                                     dimension_numbers=dn2)
    return jnp.maximum(z + b2[None, :, None, None], 0.0)


if __name__ == "__main__":
    N, C1, C2, H, W = 2, 4, 8, 16, 16

    key = jax.random.PRNGKey(0)
    kx, kw1, kb1, kw2, kb2 = jax.random.split(key, 5)

    x = jax.random.normal(kx, (N, C1, H, W), dtype=jnp.float32)
    # Deterministic synthetic parameters (shapes match nn.Conv2d in __init__).
    w1 = jax.random.normal(kw1, (C2, C1, 3, 3), dtype=jnp.float32) * 0.1
    b1 = jax.random.normal(kb1, (C2,), dtype=jnp.float32) * 0.1
    w2 = jax.random.normal(kw2, (C1, C2, 3, 3), dtype=jnp.float32) * 0.1
    b2 = jax.random.normal(kb2, (C1,), dtype=jnp.float32) * 0.1

    out = conv_block(x, w1, b1, w2, b2)
    out = jax.block_until_ready(out)

    ref = jax.block_until_ready(_reference(x, w1, b1, w2, b2))
    assert out.shape == (N, C1, H, W)
    # Tolerance reflects bf16 MXU operands (fp32 accumulation) vs fp32 reference.
    assert jnp.allclose(out, ref, atol=2e-2, rtol=2e-2)

    print("KERNEL_OK")
</pallas_src>

<mosaic_0001>
module attributes {stable_mosaic.version = 11 : i64} {
  func.func @_convblock_kernel(%arg0: i32, %arg1: memref<1x4x256xf32, #tpu.memory_space<vmem>>, %arg2: memref<8x36xbf16, #tpu.memory_space<vmem>>, %arg3: memref<8x1xf32, #tpu.memory_space<vmem>>, %arg4: memref<4x72xbf16, #tpu.memory_space<vmem>>, %arg5: memref<4x1xf32, #tpu.memory_space<vmem>>, %arg6: memref<1x4x256xf32, #tpu.memory_space<vmem>>) attributes {dimension_semantics = [#tpu.dimension_semantics<parallel>], iteration_bounds = array<i64: 2>, scalar_prefetch = 0 : i64, scratch_operands = 0 : i64, tpu.core_type = #tpu.core_type<tc>, window_params = [{transform_indices = @transform_0, window_bounds = array<i64: 1, 4, 256>}, {pipeline_mode = #tpu.pipeline_mode<synchronous>, transform_indices = @transform_1, window_bounds = array<i64: 8, 36>}, {pipeline_mode = #tpu.pipeline_mode<synchronous>, transform_indices = @transform_2, window_bounds = array<i64: 8, 1>}, {pipeline_mode = #tpu.pipeline_mode<synchronous>, transform_indices = @transform_3, window_bounds = array<i64: 4, 72>}, {pipeline_mode = #tpu.pipeline_mode<synchronous>, transform_indices = @transform_4, window_bounds = array<i64: 4, 1>}, {transform_indices = @transform_5, window_bounds = array<i64: 1, 4, 256>}]} {
    %c0 = arith.constant 0 : index
    %c0_0 = arith.constant 0 : index
    %c0_1 = arith.constant 0 : index
    %0 = vector.load %arg1[%c0, %c0_0, %c0_1] : memref<1x4x256xf32, #tpu.memory_space<vmem>>, vector<1x4x256xf32>
    %1 = vector.shape_cast %0 : vector<1x4x256xf32> to vector<4x256xf32>
    %2 = tpu.iota {dimensions = array<i32: 1>} : vector<1x256xi32>
    %c15_i32 = arith.constant 15 : i32
    %3 = vector.broadcast %c15_i32 : i32 to vector<1x256xi32>
    %4 = arith.andi %2, %3 : vector<1x256xi32>
    %c16_i32 = arith.constant 16 : i32
    %5 = vector.broadcast %c16_i32 : i32 to vector<1x256xi32>
    %6 = arith.cmpi sge, %2, %5 : vector<1x256xi32>
    %c240_i32 = arith.constant 240 : i32
    %7 = vector.broadcast %c240_i32 : i32 to vector<1x256xi32>
    %8 = arith.cmpi slt, %2, %7 : vector<1x256xi32>
    %c1_i32 = arith.constant 1 : i32
    %9 = vector.broadcast %c1_i32 : i32 to vector<1x256xi32>
    %10 = arith.cmpi sge, %4, %9 : vector<1x256xi32>
    %c14_i32 = arith.constant 14 : i32
    %11 = vector.broadcast %c14_i32 : i32 to vector<1x256xi32>
    %12 = arith.cmpi sle, %4, %11 : vector<1x256xi32>
    %c17_i32 = arith.constant 17 : i32
    %13 = tpu.dynamic_rotate %1 by %c17_i32 dim 1 : vector<4x256xf32>, i32 -> vector<4x256xf32>
    %14 = arith.andi %6, %10 : vector<1x256xi1>
    %cst = arith.constant 0.000000e+00 : f32
    %15 = vector.shape_cast %14 : vector<1x256xi1> to vector<1x256xi1>
    %16 = vector.broadcast %15 : vector<1x256xi1> to vector<4x256xi1>
    %17 = vector.broadcast %cst : f32 to vector<4x256xf32>
    %18 = arith.select %16, %13, %17 : vector<4x256xi1>, vector<4x256xf32>
    %c16_i32_2 = arith.constant 16 : i32
    %19 = tpu.dynamic_rotate %1 by %c16_i32_2 dim 1 : vector<4x256xf32>, i32 -> vector<4x256xf32>
    %cst_3 = arith.constant 0.000000e+00 : f32
    %20 = vector.shape_cast %6 : vector<1x256xi1> to vector<1x256xi1>
    %21 = vector.broadcast %20 : vector<1x256xi1> to vector<4x256xi1>
    %22 = vector.broadcast %cst_3 : f32 to vector<4x256xf32>
    %23 = arith.select %21, %19, %22 : vector<4x256xi1>, vector<4x256xf32>
    %c15_i32_4 = arith.constant 15 : i32
    %24 = tpu.dynamic_rotate %1 by %c15_i32_4 dim 1 : vector<4x256xf32>, i32 -> vector<4x256xf32>
    %25 = arith.andi %6, %12 : vector<1x256xi1>
    %cst_5 = arith.constant 0.000000e+00 : f32
    %26 = vector.shape_cast %25 : vector<1x256xi1> to vector<1x256xi1>
    %27 = vector.broadcast %26 : vector<1x256xi1> to vector<4x256xi1>
    %28 = vector.broadcast %cst_5 : f32 to vector<4x256xf32>
    %29 = arith.select %27, %24, %28 : vector<4x256xi1>, vector<4x256xf32>
    %c1_i32_6 = arith.constant 1 : i32
    %30 = tpu.dynamic_rotate %1 by %c1_i32_6 dim 1 : vector<4x256xf32>, i32 -> vector<4x256xf32>
    %cst_7 = arith.constant 0.000000e+00 : f32
    %31 = vector.shape_cast %10 : vector<1x256xi1> to vector<1x256xi1>
    %32 = vector.broadcast %31 : vector<1x256xi1> to vector<4x256xi1>
    %33 = vector.broadcast %cst_7 : f32 to vector<4x256xf32>
    %34 = arith.select %32, %30, %33 : vector<4x256xi1>, vector<4x256xf32>
    %c255_i32 = arith.constant 255 : i32
    %35 = tpu.dynamic_rotate %1 by %c255_i32 dim 1 : vector<4x256xf32>, i32 -> vector<4x256xf32>
    %cst_8 = arith.constant 0.000000e+00 : f32
    %36 = vector.shape_cast %12 : vector<1x256xi1> to vector<1x256xi1>
    %37 = vector.broadcast %36 : vector<1x256xi1> to vector<4x256xi1>
    %38 = vector.broadcast %cst_8 : f32 to vector<4x256xf32>
    %39 = arith.select %37, %35, %38 : vector<4x256xi1>, vector<4x256xf32>
    %c241_i32 = arith.constant 241 : i32
    %40 = tpu.dynamic_rotate %1 by %c241_i32 dim 1 : vector<4x256xf32>, i32 -> vector<4x256xf32>
    %41 = arith.andi %8, %10 : vector<1x256xi1>
    %cst_9 = arith.constant 0.000000e+00 : f32
    %42 = vector.shape_cast %41 : vector<1x256xi1> to vector<1x256xi1>
    %43 = vector.broadcast %42 : vector<1x256xi1> to vector<4x256xi1>
    %44 = vector.broadcast %cst_9 : f32 to vector<4x256xf32>
    %45 = arith.select %43, %40, %44 : vector<4x256xi1>, vector<4x256xf32>
    %c240_i32_10 = arith.constant 240 : i32
    %46 = tpu.dynamic_rotate %1 by %c240_i32_10 dim 1 : vector<4x256xf32>, i32 -> vector<4x256xf32>
    %cst_11 = arith.constant 0.000000e+00 : f32
    %47 = vector.shape_cast %8 : vector<1x256xi1> to vector<1x256xi1>
    %48 = vector.broadcast %47 : vector<1x256xi1> to vector<4x256xi1>
    %49 = vector.broadcast %cst_11 : f32 to vector<4x256xf32>
    %50 = arith.select %48, %46, %49 : vector<4x256xi1>, vector<4x256xf32>
    %c239_i32 = arith.constant 239 : i32
    %51 = tpu.dynamic_rotate %1 by %c239_i32 dim 1 : vector<4x256xf32>, i32 -> vector<4x256xf32>
    %52 = arith.andi %8, %12 : vector<1x256xi1>
    %cst_12 = arith.constant 0.000000e+00 : f32
    %53 = vector.shape_cast %52 : vector<1x256xi1> to vector<1x256xi1>
    %54 = vector.broadcast %53 : vector<1x256xi1> to vector<4x256xi1>
    %55 = vector.broadcast %cst_12 : f32 to vector<4x256xf32>
    %56 = arith.select %54, %51, %55 : vector<4x256xi1>, vector<4x256xf32>
    %57 = tpu.concatenate %18, %23, %29, %34, %1, %39, %45, %50, %56 in 0 : vector<4x256xf32>, vector<4x256xf32>, vector<4x256xf32>, vector<4x256xf32>, vector<4x256xf32>, vector<4x256xf32>, vector<4x256xf32>, vector<4x256xf32>, vector<4x256xf32> -> vector<36x256xf32>
    %58 = arith.truncf %57 : vector<36x256xf32> to vector<36x256xbf16>
    %c0_13 = arith.constant 0 : index
    %c0_14 = arith.constant 0 : index
    %59 = vector.load %arg2[%c0_13, %c0_14] : memref<8x36xbf16, #tpu.memory_space<vmem>>, vector<8x36xbf16>
    %cst_15 = arith.constant dense<0.000000e+00> : vector<8x256xf32>
    %60 = tpu.matmul %59, %58, %cst_15 {dimension_numbers = #tpu.dot_dimension_numbers<[1], [0], [0], [1], [0, 0, 1, 1], [], []>} : vector<8x36xbf16>, vector<36x256xbf16>, vector<8x256xf32> -> vector<8x256xf32>
    %c0_16 = arith.constant 0 : index
    %c0_17 = arith.constant 0 : index
    %61 = vector.load %arg3[%c0_16, %c0_17] : memref<8x1xf32, #tpu.memory_space<vmem>>, vector<8x1xf32>
    %62 = vector.broadcast %61 : vector<8x1xf32> to vector<8x256xf32>
    %63 = arith.addf %60, %62 : vector<8x256xf32>
    %cst_18 = arith.constant 0.000000e+00 : f32
    %64 = vector.broadcast %cst_18 : f32 to vector<8x256xf32>
    %65 = arith.maximumf %63, %64 : vector<8x256xf32>
    %c17_i32_19 = arith.constant 17 : i32
    %66 = tpu.dynamic_rotate %65 by %c17_i32_19 dim 1 : vector<8x256xf32>, i32 -> vector<8x256xf32>
    %67 = arith.andi %6, %10 : vector<1x256xi1>
    %cst_20 = arith.constant 0.000000e+00 : f32
    %68 = vector.shape_cast %67 : vector<1x256xi1> to vector<1x256xi1>
    %69 = vector.broadcast %68 : vector<1x256xi1> to vector<8x256xi1>
    %70 = vector.broadcast %cst_20 : f32 to vector<8x256xf32>
    %71 = arith.select %69, %66, %70 : vector<8x256xi1>, vector<8x256xf32>
    %c16_i32_21 = arith.constant 16 : i32
    %72 = tpu.dynamic_rotate %65 by %c16_i32_21 dim 1 : vector<8x256xf32>, i32 -> vector<8x256xf32>
    %cst_22 = arith.constant 0.000000e+00 : f32
    %73 = vector.shape_cast %6 : vector<1x256xi1> to vector<1x256xi1>
    %74 = vector.broadcast %73 : vector<1x256xi1> to vector<8x256xi1>
    %75 = vector.broadcast %cst_22 : f32 to vector<8x256xf32>
    %76 = arith.select %74, %72, %75 : vector<8x256xi1>, vector<8x256xf32>
    %c15_i32_23 = arith.constant 15 : i32
    %77 = tpu.dynamic_rotate %65 by %c15_i32_23 dim 1 : vector<8x256xf32>, i32 -> vector<8x256xf32>
    %78 = arith.andi %6, %12 : vector<1x256xi1>
    %cst_24 = arith.constant 0.000000e+00 : f32
    %79 = vector.shape_cast %78 : vector<1x256xi1> to vector<1x256xi1>
    %80 = vector.broadcast %79 : vector<1x256xi1> to vector<8x256xi1>
    %81 = vector.broadcast %cst_24 : f32 to vector<8x256xf32>
    %82 = arith.select %80, %77, %81 : vector<8x256xi1>, vector<8x256xf32>
    %c1_i32_25 = arith.constant 1 : i32
    %83 = tpu.dynamic_rotate %65 by %c1_i32_25 dim 1 : vector<8x256xf32>, i32 -> vector<8x256xf32>
    %cst_26 = arith.constant 0.000000e+00 : f32
    %84 = vector.shape_cast %10 : vector<1x256xi1> to vector<1x256xi1>
    %85 = vector.broadcast %84 : vector<1x256xi1> to vector<8x256xi1>
    %86 = vector.broadcast %cst_26 : f32 to vector<8x256xf32>
    %87 = arith.select %85, %83, %86 : vector<8x256xi1>, vector<8x256xf32>
    %c255_i32_27 = arith.constant 255 : i32
    %88 = tpu.dynamic_rotate %65 by %c255_i32_27 dim 1 : vector<8x256xf32>, i32 -> vector<8x256xf32>
    %cst_28 = arith.constant 0.000000e+00 : f32
    %89 = vector.shape_cast %12 : vector<1x256xi1> to vector<1x256xi1>
    %90 = vector.broadcast %89 : vector<1x256xi1> to vector<8x256xi1>
    %91 = vector.broadcast %cst_28 : f32 to vector<8x256xf32>
    %92 = arith.select %90, %88, %91 : vector<8x256xi1>, vector<8x256xf32>
    %c241_i32_29 = arith.constant 241 : i32
    %93 = tpu.dynamic_rotate %65 by %c241_i32_29 dim 1 : vector<8x256xf32>, i32 -> vector<8x256xf32>
    %94 = arith.andi %8, %10 : vector<1x256xi1>
    %cst_30 = arith.constant 0.000000e+00 : f32
    %95 = vector.shape_cast %94 : vector<1x256xi1> to vector<1x256xi1>
    %96 = vector.broadcast %95 : vector<1x256xi1> to vector<8x256xi1>
    %97 = vector.broadcast %cst_30 : f32 to vector<8x256xf32>
    %98 = arith.select %96, %93, %97 : vector<8x256xi1>, vector<8x256xf32>
    %c240_i32_31 = arith.constant 240 : i32
    %99 = tpu.dynamic_rotate %65 by %c240_i32_31 dim 1 : vector<8x256xf32>, i32 -> vector<8x256xf32>
    %cst_32 = arith.constant 0.000000e+00 : f32
    %100 = vector.shape_cast %8 : vector<1x256xi1> to vector<1x256xi1>
    %101 = vector.broadcast %100 : vector<1x256xi1> to vector<8x256xi1>
    %102 = vector.broadcast %cst_32 : f32 to vector<8x256xf32>
    %103 = arith.select %101, %99, %102 : vector<8x256xi1>, vector<8x256xf32>
    %c239_i32_33 = arith.constant 239 : i32
    %104 = tpu.dynamic_rotate %65 by %c239_i32_33 dim 1 : vector<8x256xf32>, i32 -> vector<8x256xf32>
    %105 = arith.andi %8, %12 : vector<1x256xi1>
    %cst_34 = arith.constant 0.000000e+00 : f32
    %106 = vector.shape_cast %105 : vector<1x256xi1> to vector<1x256xi1>
    %107 = vector.broadcast %106 : vector<1x256xi1> to vector<8x256xi1>
    %108 = vector.broadcast %cst_34 : f32 to vector<8x256xf32>
    %109 = arith.select %107, %104, %108 : vector<8x256xi1>, vector<8x256xf32>
    %110 = tpu.concatenate %71, %76, %82, %87, %65, %92, %98, %103, %109 in 0 : vector<8x256xf32>, vector<8x256xf32>, vector<8x256xf32>, vector<8x256xf32>, vector<8x256xf32>, vector<8x256xf32>, vector<8x256xf32>, vector<8x256xf32>, vector<8x256xf32> -> vector<72x256xf32>
    %111 = arith.truncf %110 : vector<72x256xf32> to vector<72x256xbf16>
    %c0_35 = arith.constant 0 : index
    %c0_36 = arith.constant 0 : index
    %112 = vector.load %arg4[%c0_35, %c0_36] : memref<4x72xbf16, #tpu.memory_space<vmem>>, vector<4x72xbf16>
    %cst_37 = arith.constant dense<0.000000e+00> : vector<4x256xf32>
    %113 = tpu.matmul %112, %111, %cst_37 {dimension_numbers = #tpu.dot_dimension_numbers<[1], [0], [0], [1], [0, 0, 1, 1], [], []>} : vector<4x72xbf16>, vector<72x256xbf16>, vector<4x256xf32> -> vector<4x256xf32>
    %c0_38 = arith.constant 0 : index
    %c0_39 = arith.constant 0 : index
    %114 = vector.load %arg5[%c0_38, %c0_39] : memref<4x1xf32, #tpu.memory_space<vmem>>, vector<4x1xf32>
    %115 = vector.broadcast %114 : vector<4x1xf32> to vector<4x256xf32>
    %116 = arith.addf %113, %115 : vector<4x256xf32>
    %cst_40 = arith.constant 0.000000e+00 : f32
    %117 = vector.broadcast %cst_40 : f32 to vector<4x256xf32>
    %118 = arith.maximumf %116, %117 : vector<4x256xf32>
    %c0_41 = arith.constant 0 : index
    %c0_42 = arith.constant 0 : index
    %c0_43 = arith.constant 0 : index
    %119 = vector.load %arg6[%c0_41, %c0_42, %c0_43] : memref<1x4x256xf32, #tpu.memory_space<vmem>>, vector<1x4x256xf32>
    %120 = vector.shape_cast %119 : vector<1x4x256xf32> to vector<4x256xf32>
    %121 = vector.shape_cast %118 : vector<4x256xf32> to vector<1x4x256xf32>
    tpu.vector_store %arg6[%c0_41, %c0_42, %c0_43], %121 {strides = array<i32>} : memref<1x4x256xf32, #tpu.memory_space<vmem>>, vector<1x4x256xf32>,
    return
  }
  func.func @transform_0(%arg0: i32) -> (i32, i32, i32) {
    %c0_i32 = arith.constant 0 : i32
    %c0_i32_0 = arith.constant 0 : i32
    %c0_i32_1 = arith.constant 0 : i32
    return %arg0, %c0_i32, %c0_i32_0 : i32, i32, i32
  }
  func.func @transform_1(%arg0: i32) -> (i32, i32) {
    %c0_i32 = arith.constant 0 : i32
    %c0_i32_0 = arith.constant 0 : i32
    %c0_i32_1 = arith.constant 0 : i32
    return %c0_i32, %c0_i32_0 : i32, i32
  }
  func.func @transform_2(%arg0: i32) -> (i32, i32) {
    %c0_i32 = arith.constant 0 : i32
    %c0_i32_0 = arith.constant 0 : i32
    %c0_i32_1 = arith.constant 0 : i32
    return %c0_i32, %c0_i32_0 : i32, i32
  }
  func.func @transform_3(%arg0: i32) -> (i32, i32) {
    %c0_i32 = arith.constant 0 : i32
    %c0_i32_0 = arith.constant 0 : i32
    %c0_i32_1 = arith.constant 0 : i32
    return %c0_i32, %c0_i32_0 : i32, i32
  }
  func.func @transform_4(%arg0: i32) -> (i32, i32) {
    %c0_i32 = arith.constant 0 : i32
    %c0_i32_0 = arith.constant 0 : i32
    %c0_i32_1 = arith.constant 0 : i32
    return %c0_i32, %c0_i32_0 : i32, i32
  }
  func.func @transform_5(%arg0: i32) -> (i32, i32, i32) {
    %c0_i32 = arith.constant 0 : i32
    %c0_i32_0 = arith.constant 0 : i32
    %c0_i32_1 = arith.constant 0 : i32
    return %arg0, %c0_i32, %c0_i32_0 : i32, i32, i32
  }
}

</mosaic_0001>

<bundles_post_ra>
// kernel: tpu_custom_call.1
= control target key start
LH: loop header
LB: loop body
LE: loop exit
PB: predicated region body
PF: predicated region fallthrough
CT: control target
= control target key end

     0   :  { %10 = vsyncpa [#allocation3], 0  ;;  %s1426_s0 = inlined_call_operand.hbm [shape: f32[2,4,256], index: 0, kind: input, shape index: {}]   ;;  %s1427_s1 = inlined_call_operand.vmem [shape: bf16[8,36], index: 1, kind: input, shape index: {}]   ;;  %s1428_s2 = inlined_call_operand.vmem [shape: f32[8,1], index: 2, kind: input, shape index: {}]   ;;  %s1429_s3 = inlined_call_operand.vmem [shape: bf16[4,72], index: 3, kind: input, shape index: {}]   ;;  %s1430_s4 = inlined_call_operand.vmem [shape: f32[4,1], index: 4, kind: input, shape index: {}]   ;;  %s1431_s5 = inlined_call_operand.hbm [shape: f32[2,4,256], index: 5, kind: output, shape index: {}]  }
   0x1   :  { %12 = vsyncpa [#allocation3 + $0x1], 0 }
   0x2   :  { %13 = vsyncpa [#allocation4], 0 }
   0x3   :  { %15 = vsyncpa [#allocation4 + $0x1], 0  ;;  %s1017_s18 = smov 0   ;;  %s1019_s19 = smov 0  }
   0x4   :  { %s1021_s20 = smov 0   ;;  %s1023_s21 = smov 0  }
   0x5 LB: > { %s1038_s22 = sadd.s32 4294967295, %s973_s21   ;;  %s695_s23 = sadd.s32 4294967294, %s973_s21   ;;  %s973_s21 = sphi %s1023_s21, %s1482_s21   ;;  %s969_s20 = sphi %s1021_s20, %s1481_s20   ;;  %s965_s19 = sphi %s1019_s19, %s1480_s19   ;;  %s961_s18 = sphi %s1017_s18, %s1479_s18  }
   0x6   : > { %s1042_s24 = sadd.s32 1, %s973_s21   ;;  %s28_s25 = sadd.s32 1, %s969_s20 }
   0x7   : > { %s25_s26 = ssub.s32 %s973_s21, %s1042_s24  ;;  %p35_p0 = scmp.ne.s32.totalorder %s969_s20, %s965_s19 }
   0x8   : > { %p26_p1 = scmp.eq.s32.totalorder %s25_s26, 0  ;;  %p36_p2 = scmp.eq.s32.totalorder %s973_s21, 0 }
   0x9   : > { %p41_p3 = scmp.ne.s32.totalorder %s965_s19, %s961_s18  ;;  %p42_p4 = scmp.eq.s32.totalorder %s1038_s22, 0 }
   0xa   : > { %s1054_s27 = scalar_select %p26_p1, %s969_s20, %s28_s25  }
   0xb   : > { %p1056_p5 = por %p36_p2, %p35_p0  ;;  %p1060_p6 = por %p42_p4, %p41_p3 }
   0xc   : > { %p149_p7 = scmp.eq.s32.totalorder %s1038_s22, 1  ;;  %p155_p8 = scmp.eq.s32.totalorder %s695_s23, 1 }
   0xd   : > { %p751_p10 = scmp.lt.s32.totalorder %s973_s21, 2  ;;  %s187_s7 = sand.u32 1, %s969_s20  }
   0xe   : > { %p1067_p11 = por %p149_p7, %p35_p0  ;;  %p1071_p12 = por %p155_p8, %p41_p3 }
   0xf   : > { %s737_s8 = sshll.u32 %s973_s21, 7  ;;  %s698_s9 = sshll.u32 %s187_s7, 3 }
  0x10   : > { %s1442_s30 = scalar_select %p1067_p11, 1, 0 }
  0x11   : > { %s1443_s6 = scalar_select %p1071_p12, 1, 0 }
  0x12   : > { %s1080_s12 = scalar_lea.hbm %s1426_s0, %s737_s8  ;;  %s191_s13 = scalar_lea.vmem [#allocation2], %s698_s9 }
  0x13   : > { %s199_s14 = sshll.u32 %s191_s13, 4  ;;  %p1084_p13 = pnand %p751_p10, %p1056_p5  ;;  %s1088_s14 = int_to_ptr.vmem [resolvable:$true] %s199_s14 }
  0x14   : > { %s188_s16 = scalar_lea.sflag [#allocation3], %s187_s7  ;;  %s877_s17 = scalar_lea.hbm %s1080_s12, 128 }
  0x15   : > { %p878_p2 = scmp.ne.s32.totalorder %s1080_s12, %s877_s17  ;;  %p879_p3 = pneg %p1084_p13 }
  0x16   : > { %s882_s26 = scalar_lea.hbm %s1426_s0, 256  ;;  %p883_p5 = scmp.lt.u32.totalorder %s1080_s12, %s1426_s0 }
  0x17   : > { %p880_p4 = pnand %p879_p3, %p878_p2  ;;  %p884_p8 = scmp.lt.u32.totalorder %s882_s26, %s877_s17 }
  0x18   : > { %p886_p9 = scmp.lt.u32.totalorder %s877_s17, %s1080_s12 }
  0x19   : > { %p881_p7 = pneg %p880_p4  ;;  %p885_p10 = por %p884_p8, %p883_p5 }
  0x1b   : > { %p887_p0 = por %p886_p9, %p885_p10 }
  0x1d   : > { %p888_p1 = pnand %p887_p0, %p881_p7 }
  0x1f   : > { %891 = shalt.err (!%p888_p1)
}
  0x20   : > { %s892_s7 = scalar_lea.vmem %s1088_s14, 128  ;;  %s975_s9 = smov [#allocation2]  }
  0x21   : > { %p893_p2 = scmp.ne.s32.totalorder %s1088_s14, %s892_s7  ;;  %s897_s10 = sshll.u32 %s975_s9, 4  ;;  %s898_s10 = int_to_ptr.vmem [resolvable:$false] %s897_s10 }
  0x22   : > { %s899_s11 = scalar_lea.vmem %s898_s10, 256  ;;  %p900_p11 = scmp.lt.s32.totalorder %s1088_s14, %s898_s10 }
  0x23   : > { %p895_p4 = pnand %p893_p2, %p879_p3  ;;  %p901_p5 = scmp.lt.s32.totalorder %s899_s11, %s892_s7 }
  0x25   : > { %p896_p12 = pneg %p895_p4  ;;  %p902_p8 = por %p901_p5, %p900_p11 }
  0x27   : > { %p903_p9 = pnand %p902_p8, %p896_p12 }
  0x29   : > { %906 = shalt.err (!%p903_p9)
}
  0x2a   : > { %746 = dma.hbm_to_vmem [thread:$0]  (!%p1084_p13), %s1080_s12, 128, %s1088_s14, %s188_s16  }
  0x2b   : > { %p1445_p0 = scmp.lt.s32.totalorder %s973_s21, 3  ;;  %p1446_p1 = scmp.ge.s32.totalorder %s973_s21, 1 }
  0x2d   : > { %p205_p3 = pnand %p1446_p1, %p1445_p0 }
  0x2e   : > { %s1122_s13 = sand.u32 (!%p205_p3), 1, %s965_s19  }
  0x2f   : > { %208 = sbr.rel (%p205_p3) target bundleno = 799 (0x31f), region = 40  ;;  %s702_s17 = sshll.u32 (!%p205_p3), %s1122_s13, 3 }
  0x30   : > { %s211_s23 = scalar_lea.sflag (!%p205_p3), [#allocation3], %s1122_s13  ;;  %s214_s15 = scalar_lea.vmem (!%p205_p3), [#allocation2], %s702_s17 }
  0x36   : > { %952 = dma.done.wait (%p1060_p6), %s211_s23, 128  }
  0x37   : > { %954 = vsyncadd (%p1060_p6), %s211_s23, 4294967168  ;;  %v1132_v0 = vld [vmem:[%s214_s15] sm:$0xff]  ;;  %s976_s12 = smov 17   ;;  %s977_s14 = smov 1   ;;  %v984_v3 = vmov 0   ;;  %v243_v5 = vlaneseq  ;;  %vm1438_vm10 = vcmask 1043456  }
  0x38   : > { %v1136_v1 = vcombine.high %v1132_v0, %v1132_v0  ;;  %s978_s16 = smov 15   ;;  %s979_s29 = smov 16   ;;  %460 = vmatprep.mubr.bf16.mxu0 %v984_v3  ;;  %835 = vset.pattern.permute.xlu0 %v984_v3  ;;  %v411_v4 = vld [vmem:[%s1428_s2] sm:$0xff] }
  0x39   : > { %s980_s25 = smov 127   ;;  %s981_s26 = smov 112   ;;  %594 = vmatprep.mubr.bf16.mxu1 %v984_v3  ;;  %v1151_v6 = vand.u32 127, %v243_v5  ;;  %v545_v13 = vld [vmem:[%s1429_s3] sm:$0x3] }
  0x3a   : > { %v805_v2 = vpack.i.bf16 %v1136_v1, %v1132_v0  ;;  %s982_s28 = smov 113   ;;  %s983_s8 = smov 111  }
  0x3b   : > { %v1154_v7 = vadd.s32 128, %v1151_v6  ;;  %v246_v8 = vand.u32 15, %v1151_v6  ;;  %vm1433_vm0 = vcmp.lt.s32.totalorder %v1151_v6, 1  ;;  %vm278_vm1 = vcmp.lt.s32.totalorder %v1151_v6, 16  ;;  %s611_s7 = scalar_lea.sflag [#allocation4], %s1122_s13  ;;  %p1476_p11 = scmp.ne.s32.totalorder %s1442_s30, 0 }
  0x3c   : > { %806 = vrot.lane.b32.xlu1 %v805_v2, %s976_s12  ;;  %796 = vrot.lane.b32.xlu0 %v805_v2, %s977_s14  ;;  %vm1435_vm2 = vcmp.lt.s32.totalorder %v1151_v6, 127  ;;  %vm263_vm4 = vcmp.lt.s32.totalorder %v1151_v6, 17  ;;  %vm248_vm5 = vcmp.ge.s32.totalorder %v1151_v6, 16  ;;  %vm291_vm9 = vcmp.lt.s32.totalorder %v1151_v6, 15 }
  0x3d   : > { %v247_v9 = vand.u32 15, %v1154_v7  ;;  %vm1167_vm6 = vcmp.ge.s32.totalorder %v246_v8, 1  ;;  %vm1171_vm7 = vcmp.le.s32.totalorder %v246_v8, 14  ;;  %vm1436_vm12 = vcmp.lt.s32.totalorder %v1154_v7, 240 }
  0x3e   : > { %vm1192_vm11 = vmand %vm248_vm5, %vm1167_vm6  ;;  %vm1434_vm13 = vcmp.lt.s32.totalorder %v1151_v6, 112  ;;  %vm1439_vm14 = vcmp.lt.s32.totalorder %v1151_v6, 113 }
  0x3f   : > { %vm1161_vm3 = vcmp.ge.s32.totalorder %v247_v9, 1  ;;  %vm1175_vm8 = vcmp.le.s32.totalorder %v247_v9, 14  ;;  %vm1207_vm15 = vmand %vm248_vm5, %vm1171_vm7 }
  0x40   : > { %811 = vrot.lane.b32.xlu1 %v805_v2, %s978_s16  ;;  %801 = vrot.lane.b32.xlu0 %v805_v2, %s979_s29 }
  0x44   : > { %816 = vrot.lane.b32.xlu0 %v805_v2, %s980_s25  ;;  %821 = vrot.lane.b32.xlu1 %v805_v2, %s981_s26 }
  0x48   : > { %826 = vrot.lane.b32.xlu0 %v805_v2, %s982_s28  ;;  %831 = vrot.lane.b32.xlu1 %v805_v2, %s983_s8 }
  0x4c   : > { %414 = vperm.xlu0 %835, %v411_v4  }
  0xae   : > { %v807_v10 = vpop.permute.xlu1 %806  ;;  %v797_v11 = vpop.permute.xlu0 %796 }
  0xaf   : > { %v809_v14 = vunpack.i.h.bf16 %v807_v10  ;;  %v808_v15 = vunpack.i.l.bf16 %v807_v10  ;;  %v799_v16 = vunpack.i.h.bf16 %v797_v11  ;;  %v798_v17 = vunpack.i.l.bf16 %v797_v11 }
  0xb1   : > { %v307_v20 = vsel %vm1433_vm0, %v798_v17, %v799_v16  ;;  %v308_v21 = vsel %vm1433_vm0, %v799_v16, %v798_v17  ;;  %v264_v22 = vsel %vm263_vm4, %v808_v15, %v809_v14  ;;  %v265_v23 = vsel %vm263_vm4, %v809_v14, %v808_v15 }
  0xb2   : > { %v812_v25 = vpop.permute.xlu1 %811  ;;  %v802_v26 = vpop.permute.xlu0 %801  ;;  %v314_v27 = vsel %vm1161_vm3, %v307_v20, 0.0  ;;  %v313_v28 = vsel %vm1167_vm6, %v308_v21, 0.0  ;;  %v273_v34 = vsel %vm1161_vm3, %v264_v22, 0.0  ;;  %v272_v36 = vsel %vm1192_vm11, %v265_v23, 0.0 }
  0xb3   : > { %v814_v29 = vunpack.i.h.bf16 %v812_v25  ;;  %v813_v30 = vunpack.i.l.bf16 %v812_v25  ;;  %v804_v31 = vunpack.i.h.bf16 %v802_v26  ;;  %v803_v32 = vunpack.i.l.bf16 %v802_v26 }
  0xb4   : > { %v380_v35 = vrot.slane %v314_v27, 4  ;;  %v379_v37 = vrot.slane %v313_v28, 4  ;;  %vm1437_vm0 = vcmp.lt.s32.totalorder %v1151_v6, 111 }
  0xb5   : > { %v280_v38 = vsel %vm278_vm1, %v804_v31, %v803_v32  ;;  %v279_v39 = vsel %vm278_vm1, %v803_v32, %v804_v31  ;;  %v292_v40 = vsel %vm291_vm9, %v813_v30, %v814_v29  ;;  %v293_v41 = vsel %vm291_vm9, %v814_v29, %v813_v30 }
  0xb6   : > { %v817_v42 = vpop.permute.xlu0 %816  ;;  %v822_v43 = vpop.permute.xlu1 %821  ;;  %v301_v44 = vsel %vm1175_vm8, %v292_v40, 0.0  ;;  %v374_v45 = vrot.slane %v279_v39, 4  ;;  %v285_v46 = vsel %vm248_vm5, %v280_v38, 0.0  ;;  %v300_v47 = vsel %vm1207_vm15, %v293_v41, 0.0  ;;  %v410_v39 = vld [vmem:[%s1427_s1] sm:$0xf] }
  0xb7   : > { %v819_v48 = vunpack.i.h.bf16 %v817_v42  ;;  %v818_v49 = vunpack.i.l.bf16 %v817_v42  ;;  %v824_v50 = vunpack.i.h.bf16 %v822_v43  ;;  %v823_v51 = vunpack.i.l.bf16 %v822_v43 }
  0xb8   : > { %v397_v52 = vsel %vm1438_vm10, %v273_v34, %v374_v45  ;;  %v399_v53 = vsel %vm1438_vm10, %v301_v44, %v380_v35  ;;  %v373_v54 = vrot.slane %v285_v46, 4  ;;  %v398_v55 = vsel %vm1438_vm10, %v300_v47, %v379_v37 }
  0xb9   : > { %v320_v56 = vsel %vm1435_vm2, %v818_v49, %v819_v48  ;;  %v321_v57 = vsel %vm1435_vm2, %v819_v48, %v818_v49  ;;  %v348_v58 = vsel %vm1434_vm13, %v823_v51, %v824_v50  ;;  %v349_v59 = vsel %vm1434_vm13, %v824_v50, %v823_v51  ;;  %vm1252_vm13 = vmand %vm1436_vm12, %vm1161_vm3  ;;  %v546_v50 = vld [vmem:[%s1430_s4] sm:$0xf] }
  0xba   : > { %v326_v60 = vsel %vm1171_vm7, %v320_v56, 0.0  ;;  %v327_v61 = vsel %vm1175_vm8, %v321_v57, 0.0  ;;  %v355_v62 = vsel %vm1436_vm12, %v349_v59, 0.0  ;;  %v391_v63 = vrot.slane %v348_v58, 4  ;;  %v827_v2 = vpop.permute.xlu0 %826  ;;  %v832_v3 = vpop.permute.xlu1 %831  ;;  %vm1260_vm2 = vmand %vm1436_vm12, %vm1175_vm8 }
  0xbb   : > { %v385_v4 = vrot.slane %v326_v60, 4  ;;  %v386_v5 = vrot.slane %v327_v61, 4  ;;  %v392_v8 = vrot.slane %v355_v62, 4  ;;  %v829_v9 = vunpack.i.h.bf16 %v827_v2 }
  0xbc   : > { %v828_v10 = vunpack.i.l.bf16 %v827_v2  ;;  %v405_v11 = vpack.c.bf16 %v399_v53, %v397_v52  ;;  %v396_v14 = vsel %vm1438_vm10, %v272_v36, %v373_v54  ;;  %v834_v15 = vunpack.i.h.bf16 %v832_v3 }
  0xbd   : > { %v404_v17 = vpack.c.bf16 %v398_v55, %v396_v14  ;;  %v833_v21 = vunpack.i.l.bf16 %v832_v3  ;;  %v401_v25 = vsel %vm1438_vm10, %v1136_v1, %v386_v5  ;;  %v400_v26 = vsel %vm1438_vm10, %v1132_v0, %v385_v4 }
  0xbe   : > { %v333_v22 = vsel %vm1439_vm14, %v828_v10, %v829_v9  ;;  %v334_v23 = vsel %vm1439_vm14, %v829_v9, %v828_v10  ;;  %428 = vmatprep.subr.bf16.mxu0 %v405_v11  ;;  %vm421_vm12 = vcmask 1041408  }
  0xbf   : > { %429 = vmatpush1.bf16.msra.mxu0 %v404_v17  ;;  %v362_v27 = vsel %vm1437_vm0, %v834_v15, %v833_v21  ;;  %v342_v28 = vsel %vm1252_vm13, %v334_v23, 0.0  ;;  %v341_v29 = vsel %vm1167_vm6, %v333_v22, 0.0  ;;  %v361_v30 = vsel %vm1437_vm0, %v833_v21, %v834_v15 }
  0xc0   : > { %v370_v31 = vsel %vm1260_vm2, %v362_v27, 0.0  ;;  %v403_v1 = vsel %vm1438_vm10, %v342_v28, %v392_v8  ;;  %v402_v0 = vsel %vm1438_vm10, %v341_v29, %v391_v63  ;;  %v369_v32 = vsel %vm1171_vm7, %v361_v30, 0.0 }
  0xc1   : > { %v407_v34 = vpack.c.bf16 %v403_v1, %v401_v25  ;;  %v406_v35 = vpack.c.bf16 %v402_v0, %v400_v26  ;;  %v409_v36 = vpack.c.bf16 %v370_v31, %v370_v31  ;;  %v408_v37 = vpack.c.bf16 %v369_v32, %v369_v32 }
  0xc2   : > { %vm417_vm0 = vcmask 293888   ;;  %vm1464_vm10 = vcmp.lt.s32.totalorder %v1151_v6, 1 }
  0xc3   : > { %430 = vmatprep.subr.bf16.mxu0 %v407_v34  ;;  %v423_v38 = vsel %vm421_vm12, %v408_v37, 0  ;;  %vm1465_vm14 = vmmov %vm1464_vm10 }
  0xc4   : > { %431 = vmatpush1.bf16.msra.mxu0 %v406_v35 }
  0xc5   : > { %704 = vmatprep.subr.msk.bf16.mxu0 %vm421_vm12, %v409_v36 }
  0xc8   : > { %433 = vmatpush1.bf16.msra.mxu0 %v423_v38 }
  0xcb   : > { %705 = vmatmul.mubr.msk.bf16.vlgmr.msra.gmra.mrb[0].mxu0 %vm417_vm0, %v410_v39  ;;  %v415_v40 = vpop.permute.xlu0 %414  ;;  %vm985_vm0 = vmmov 1  }
  0xcc   : > { %vm706_vm12 = vmpackc.low %vm985_vm0, %vm1161_vm3 }
 0x19e   : > { %v462_v41 = vpop.f32.mrb[0].mxu0 }
 0x19f   : > { %v1289_v42 = vadd.f32 %v462_v41, %v415_v40  ;;  %v464_v43 = vpop.f32.mrb[1].mxu0 }
 0x1a0   : > { %v465_v44 = vadd.f32 %v464_v43, %v415_v40  ;;  %v466_v45 = vpop.f32.mrb[2].mxu0 }
 0x1a1   : > { %v469_v46 = vmax.f32 %v1289_v42, 0.0  ;;  %v467_v47 = vpop.f32.mrb[3].mxu0 }
 0x1a2   : > { %v470_v48 = vmax.f32 %v465_v44, 0.0 }
 0x1a4   : > { %v846_v49 = vpack.i.bf16 %v470_v48, %v469_v46 }
 0x1a6   : > { %847 = vrot.lane.b32.xlu0 %v846_v49, %s978_s16  ;;  %837 = vrot.lane.b32.xlu1 %v846_v49, %s976_s12  ;;  %s738_s16 = sshll.u32 %s1038_s22, 7  ;;  %s986_s22 = smov [#allocation5]  }
 0x1aa   : > { %857 = vrot.lane.b32.xlu0 %v846_v49, %s980_s25  ;;  %842 = vrot.lane.b32.xlu1 %v846_v49, %s979_s29  ;;  %s240_s29 = scalar_lea.vmem [#allocation5], %s702_s17  ;;  %s911_s17 = sshll.u32 %s986_s22, 4  ;;  %s912_s17 = int_to_ptr.vmem [resolvable:$false] %s911_s17 }
 0x1ab   : > { %s625_s25 = sshll.u32 %s240_s29, 4  ;;  %s913_s10 = scalar_lea.vmem %s912_s17, 256  ;;  %s1384_s25 = int_to_ptr.vmem [resolvable:$true] %s625_s25 }
 0x1ac   : > { %s907_s9 = scalar_lea.vmem %s1384_s25, 128  ;;  %p914_p7 = scmp.lt.s32.totalorder %s1384_s25, %s912_s17 }
 0x1ad   : > { %p908_p6 = scmp.ne.s32.totalorder %s1384_s25, %s907_s9  ;;  %p915_p10 = scmp.lt.s32.totalorder %s913_s10, %s907_s9 }
 0x1ae   : > { %867 = vrot.lane.b32.xlu0 %v846_v49, %s981_s26  ;;  %852 = vrot.lane.b32.xlu1 %v846_v49, %s977_s14 }
 0x1af   : > { %p909_p12 = pnand %p908_p6, %p1476_p11  ;;  %p916_p2 = por %p915_p10, %p914_p7 }
 0x1b1   : > { %p910_p13 = pneg %p909_p12 }
 0x1b2   : > { %549 = vperm.xlu0 %835, %v546_v50   ;;  %862 = vrot.lane.b32.xlu1 %v846_v49, %s982_s28 }
 0x1b3   : > { %p917_p4 = pnand %p916_p2, %p910_p13 }
 0x1b6   : > { %872 = vrot.lane.b32.xlu1 %v846_v49, %s983_s8  ;;  %s1382_s8 = scalar_lea.hbm %s1431_s5, %s738_s16 }
 0x218   : > { %v848_v51 = vpop.permute.xlu0 %847  ;;  %v838_v52 = vpop.permute.xlu1 %837 }
 0x219   : > { %v840_v53 = vunpack.i.h.bf16 %v838_v52  ;;  %v839_v54 = vunpack.i.l.bf16 %v838_v52  ;;  %v850_v59 = vunpack.i.h.bf16 %v848_v51  ;;  %v849_v60 = vunpack.i.l.bf16 %v848_v51 }
 0x21b   : > { %v475_v61 = vsel %vm263_vm4, %v839_v54, %v840_v53  ;;  %v476_v62 = vsel %vm263_vm4, %v840_v53, %v839_v54  ;;  %vm709_vm4 = vmpackc.low %vm248_vm5, %vm1192_vm11  ;;  %v491_v14 = vsel %vm291_vm9, %v849_v60, %v850_v59  ;;  %v492_v17 = vsel %vm291_vm9, %v850_v59, %v849_v60 }
 0x21c   : > { %v858_v55 = vpop.permute.xlu0 %857  ;;  %v843_v56 = vpop.permute.xlu1 %842  ;;  %vm712_vm5 = vmpackc.low %vm1161_vm3, %vm1175_vm8  ;;  %vm1467_vm3 = vcmp.lt.s32.totalorder %v1151_v6, 113 }
 0x21d   : > { %v845_v57 = vunpack.i.h.bf16 %v843_v56  ;;  %v844_v58 = vunpack.i.l.bf16 %v843_v56  ;;  %v860_v63 = vunpack.i.h.bf16 %v858_v55  ;;  %v859_v2 = vunpack.i.l.bf16 %v858_v55  ;;  %vm715_vm9 = vmpackc.low %vm1167_vm6, %vm1207_vm15 }
 0x21e   : > { %vm1469_vm15 = vcmp.lt.s32.totalorder %v1154_v7, 240 }
 0x21f   : > { %v483_v3 = vsel %vm278_vm1, %v844_v58, %v845_v57  ;;  %v484_v4 = vsel %vm278_vm1, %v845_v57, %v844_v58  ;;  %vm1463_vm1 = vcmp.lt.s32.totalorder %v1151_v6, 127 }
 0x220   : > { %v853_v5 = vpop.permute.xlu1 %852  ;;  %v707_v8 = vpack.c.bf16 %v483_v3, %v475_v61  ;;  %v710_v9 = vpack.c.bf16 %v484_v4, %v476_v62  ;;  %v868_v15 = vpop.permute.xlu0 %867  ;;  %v508_v21 = vsel %vm1463_vm1, %v860_v63, %v859_v2  ;;  %vm1466_vm11 = vmmov %vm1463_vm1  ;;  %vm1471_vm1 = vcmp.lt.s32.totalorder %v1151_v6, 111 }
 0x221   : > { %v855_v10 = vunpack.i.h.bf16 %v853_v5  ;;  %v854_v11 = vunpack.i.l.bf16 %v853_v5  ;;  %v870_v27 = vunpack.i.h.bf16 %v868_v15  ;;  %v869_v28 = vunpack.i.l.bf16 %v868_v15 }
 0x222   : > { %708 = vmatprep.subr.msk.bf16.mxu1 %vm706_vm12, %v707_v8  ;;  %v507_v12 = vsel %vm1466_vm11, %v859_v2, %v860_v63  ;;  %v719_v31 = vpack.c.bf16 %v508_v21, %v470_v48  ;;  %vm724_vm12 = vmpackc.low %vm1469_vm15, %vm1252_vm13 }
 0x223   : > { %v499_v24 = vsel %vm1464_vm10, %v854_v11, %v855_v10  ;;  %v500_v22 = vsel %vm1465_vm14, %v855_v10, %v854_v11  ;;  %711 = vmatpush1.bf16.msk.msra.mxu1 %vm709_vm4, %v710_v9  ;;  %vm718_vm10 = vmpackc.low %vm1175_vm8, %vm985_vm0  ;;  %v722_v0 = vpack.c.bf16 %v507_v12, %v469_v46  ;;  %vm1468_vm8 = vcmp.lt.s32.totalorder %v1151_v6, 112 }
 0x224   : > { %v713_v23 = vpack.c.bf16 %v499_v24, %v491_v14  ;;  %v716_v25 = vpack.c.bf16 %v500_v22, %v492_v17  ;;  %v863_v26 = vpop.permute.xlu1 %862  ;;  %vm721_vm14 = vmpackc.low %vm1171_vm7, %vm985_vm0  ;;  %v524_v19 = vsel %vm1468_vm8, %v870_v27, %v869_v28 }
 0x225   : > { %v865_v29 = vunpack.i.h.bf16 %v863_v26  ;;  %v864_v30 = vunpack.i.l.bf16 %v863_v26  ;;  %vm1470_vm4 = vmmov %vm1467_vm3 }
 0x226   : > { %714 = vmatprep.subr.msk.bf16.mxu1 %vm712_vm5, %v713_v23  ;;  %vm1472_vm5 = vmmov %vm1471_vm1 }
 0x227   : > { %v516_v1 = vsel %vm1467_vm3, %v865_v29, %v864_v30  ;;  %717 = vmatpush1.bf16.msk.msra.mxu1 %vm715_vm9, %v716_v25  ;;  %v515_v35 = vsel %vm1470_vm4, %v864_v30, %v865_v29  ;;  %vm1473_vm9 = vmmov %vm1468_vm8 }
 0x228   : > { %v873_v33 = vpop.permute.xlu1 %872  ;;  %720 = vmatprep.subr.msk.bf16.mxu1 %vm718_vm10, %v719_v31  ;;  %v725_v36 = vpack.c.bf16 %v524_v19, %v516_v1  ;;  %v523_v39 = vsel %vm1473_vm9, %v869_v28, %v870_v27  ;;  %vm727_vm13 = vmpackc.low %vm985_vm0, %vm1167_vm6  ;;  %vm1474_vm10 = vcmask 1043456  }
 0x229   : > { %v875_v32 = vunpack.i.h.bf16 %v873_v33  ;;  %v874_v34 = vunpack.i.l.bf16 %v873_v33  ;;  %v728_v40 = vpack.c.bf16 %v523_v39, %v515_v35  ;;  %vm1475_vm11 = vmmov %vm1474_vm10 }
 0x22b   : > { %v532_v37 = vsel %vm1471_vm1, %v875_v32, %v874_v34  ;;  %723 = vmatpush1.bf16.msk.msra.mxu1 %vm721_vm14, %v722_v0  ;;  %v531_v38 = vsel %vm1472_vm5, %v874_v34, %v875_v32 }
 0x22c   : > { %v534_v16 = vsel %vm1260_vm2, %v532_v37, 0.0  ;;  %726 = vmatprep.subr.msk.bf16.mxu1 %vm724_vm12, %v725_v36  ;;  %v533_v7 = vsel %vm1171_vm7, %v531_v38, 0.0  ;;  %vm552_vm2 = vcmask 588800  }
 0x22d   : > { %v544_v41 = vpack.c.bf16 %v534_v16, %v534_v16  ;;  %v543_v42 = vpack.c.bf16 %v533_v7, %v533_v7 }
 0x22f   : > { %729 = vmatpush1.bf16.msk.msra.mxu1 %vm727_vm13, %v728_v40  ;;  %v557_v6 = vsel %vm1475_vm11, %v543_v42, 0 }
 0x230   : > { %730 = vmatprep.subr.msk.bf16.mxu1 %vm1474_vm10, %v544_v41 }
 0x231   : > { %v550_v20 = vpop.permute.xlu0 %549 }
 0x233   : > { %571 = vmatpush1.bf16.msra.mxu1 %v557_v6 }
 0x236   : > { %731 = vmatmul.mubr.msk.bf16.vlgmr.msra.gmra.mrb[0].mxu1 %vm552_vm2, %v545_v13 }
 0x309   : > { %v596_v18 = vpop.f32.mrb[0].mxu1 }
 0x30a   : > { %v597_v43 = vadd.f32 %v596_v18, %v550_v20  ;;  %v598_v44 = vpop.f32.mrb[1].mxu1 }
 0x30b   : > { %v599_v45 = vadd.f32 %v598_v44, %v550_v20  ;;  %v600_v46 = vpop.f32.mrb[2].mxu1 }
 0x30c   : > { %v603_v47 = vmax.f32 %v597_v43, 0.0  ;;  %v601_v48 = vpop.f32.mrb[3].mxu1 }
 0x30d   : > { %v604_v49 = vmax.f32 %v599_v45, 0.0 }
 0x30f   : > { %v607_v50 = vcombine.low %v603_v47, %v604_v49 }
 0x311   : > { %609 = vst [vmem:[%s240_s29] sm:$0xff] %v607_v50 }
 0x312   : > { %920 = shalt.err (!%p917_p4)
}
 0x313   : > { %s921_s13 = scalar_lea.hbm %s1382_s8, 128  ;;  %s925_s15 = scalar_lea.hbm %s1431_s5, 256 }
 0x314   : > { %p922_p5 = scmp.ne.s32.totalorder %s1382_s8, %s921_s13  ;;  %p926_p0 = scmp.lt.u32.totalorder %s1382_s8, %s1431_s5 }
 0x315   : > { %p927_p1 = scmp.lt.u32.totalorder %s925_s15, %s921_s13  ;;  %p929_p6 = scmp.lt.u32.totalorder %s921_s13, %s1382_s8 }
 0x316   : > { %p923_p8 = pnand %p922_p5, %p1476_p11 }
 0x317   : > { %p928_p3 = por %p927_p1, %p926_p0 }
 0x318   : > { %p924_p9 = pneg %p923_p8 }
 0x319   : > { %p930_p12 = por %p929_p6, %p928_p3 }
 0x31b   : > { %p931_p13 = pnand %p930_p12, %p924_p9 }
 0x31d   : > { %934 = shalt.err (!%p931_p13)
}
 0x31e   : > { %741 = dma.vmem_to_hbm [thread:$0]  (%p1476_p11), %s1384_s25, 128, %s1382_s8, %s611_s7  }
 0x31f PF: > { %s637_s16 = sand.u32 1, %s961_s18   ;;  %p1477_p7 = scmp.ne.s32.totalorder %s1443_s6, 0 }
 0x320   : > { %p1478_p10 = scmp.ge.s32.totalorder %s973_s21, 2  ;;  %s638_s29 = scalar_lea.sflag [#allocation4], %s637_s16 }
 0x322   : > { %p748_p2 = pnand %p1478_p10, %p1477_p7 }
 0x324   : > { %956 = dma.done.wait (!%p748_p2), %s638_s29, 128  }
 0x325   : > { %958 = vsyncadd (!%p748_p2), %s638_s29, 4294967168  ;;  %p18_p4 = scmp.ge.s32.totalorder %s1042_s24, 4   ;;  %s1479_s18 = smov %s965_s19 }
 0x326   : > { %s1480_s19 = smov %s969_s20  ;;  %s1481_s20 = smov %s1054_s27 }
 0x327   : > { %s1482_s21 = smov %s1042_s24  ;;  %20 = sbr.rel (!%p18_p4) target bundleno = 5 (0x5), region = 85 }
 0x32e   :  { %643 = vsyncpa [#allocation3], 1 }
 0x32f   :  { %645 = vsyncpa [#allocation3 + $0x1], 1 }
 0x330   :  { %646 = vsyncpa [#allocation4], 1 }
 0x331   :  { %648 = vsyncpa [#allocation4 + $0x1], 1 }

</bundles_post_ra>
